<compile_context>
chip_gen: v5e
topology: v5e:2x2
jax: 0.10.0
libtpu: 0.0.40
codegen_flags: <defaults>
</compile_context>

<pallas_src>
import functools

import jax
import jax.numpy as jnp
from jax import lax
from jax.experimental import pallas as pl
from jax.experimental.pallas import tpu as pltpu

BN_EPS = 1e-5
LANE = 128
SUBLANE = 8


def _round_up(n, m):
    return ((n + m - 1) // m) * m


def _vmem_limit_bytes():
    """Per-generation scoped-VMEM budget (review: ~48 MiB on v7x's 64 MiB,
    ~96 MiB on v5e/v6e's 128 MiB).  Falls back conservatively if the hardware
    query is unavailable."""
    try:
        cap = pltpu.get_tpu_info().vmem_capacity_bytes
    except Exception:
        cap = 64 * 1024 * 1024
    return int(min(cap * 3 // 4, 100 * 1024 * 1024))


# ---------------------------------------------------------------------------
# One-time parameter preparation (hoisted out of the per-call hot path).
# ---------------------------------------------------------------------------
def prepare_params(params, compute_dtype=jnp.float32):
    """Transpose, zero-pad to 128 lanes and pack the weights ONCE.

    Returns a dict holding:
      wslab  : (inp_p + 2*hid_p, WP) sublane-stacked [W1^T ; W2^T ; W3^T]
      vecslab: (8, WP) rows = [g1, beta1, g2, beta2, b3, 0, 0, 0] (f32)
      dims   : static layout dims
    b1/b2 are intentionally NOT packed (cancelled by train-mode BN).
    """
    f32 = jnp.float32
    hid, inp_dim = params["w1"].shape
    out_dim = params["w3"].shape[0]

    inp_p = _round_up(inp_dim, SUBLANE)
    hid_p = _round_up(hid, LANE)
    out_p = _round_up(out_dim, LANE)
    wp = max(hid_p, out_p)

    wslab = jnp.zeros((inp_p + 2 * hid_p, wp), f32)
    wslab = wslab.at[:inp_dim, :hid].set(params["w1"].T.astype(f32))
    wslab = wslab.at[inp_p:inp_p + hid, :hid].set(params["w2"].T.astype(f32))
    wslab = wslab.at[inp_p + hid_p:inp_p + hid_p + hid, :out_dim].set(
        params["w3"].T.astype(f32))

    vecslab = jnp.zeros((SUBLANE, wp), f32)
    vecslab = vecslab.at[0, :hid].set(params["g1"].astype(f32))
    vecslab = vecslab.at[1, :hid].set(params["beta1"].astype(f32))
    vecslab = vecslab.at[2, :hid].set(params["g2"].astype(f32))
    vecslab = vecslab.at[3, :hid].set(params["beta2"].astype(f32))
    vecslab = vecslab.at[4, :out_dim].set(params["b3"].astype(f32))

    return {
        "wslab": wslab.astype(compute_dtype),   # MXU operands (f32 or bf16)
        "vecslab": vecslab,                     # BN/bias vectors stay f32
        "dims": (inp_dim, hid, out_dim, inp_p, hid_p, out_p, wp),
        "compute_dtype": compute_dtype,
    }


# ---------------------------------------------------------------------------
# Small-N kernel: whole batch resident in VMEM, single-pass BN stats.
# ---------------------------------------------------------------------------
def _mlp_small_kernel(x_ref, w_ref, vec_ref, o_ref, *, inp_p, hid_p, out_p):
    w1 = w_ref[0:inp_p, 0:hid_p]
    w2 = w_ref[inp_p:inp_p + hid_p, 0:hid_p]
    w3 = w_ref[inp_p + hid_p:inp_p + 2 * hid_p, 0:out_p]
    wdt = w1.dtype

    def bn_relu(h, g, beta):
        mean = jnp.mean(h, axis=0, keepdims=True)                    # (1, H)
        var = jnp.mean(h * h, axis=0, keepdims=True) - mean * mean
        var = jnp.maximum(var, 0.0)                # clamp: cancellation guard
        scale = g * lax.rsqrt(var + BN_EPS)
        shift = beta - mean * scale
        return jnp.maximum(h * scale + shift, 0.0)

    h = jnp.dot(x_ref[...], w1, preferred_element_type=jnp.float32)
    h = bn_relu(h, vec_ref[0:1, 0:hid_p], vec_ref[1:2, 0:hid_p])
    h = jnp.dot(h.astype(wdt), w2, preferred_element_type=jnp.float32)
    h = bn_relu(h, vec_ref[2:3, 0:hid_p], vec_ref[3:4, 0:hid_p])
    o_ref[...] = (jnp.dot(h.astype(wdt), w3, preferred_element_type=jnp.float32)
                  + vec_ref[4:5, 0:out_p]).astype(o_ref.dtype)


# ---------------------------------------------------------------------------
# Large-N kernel: grid = (phase, batch_tile).  Phase 0 accumulates layer-1
# column sums / sum-of-squares, phase 1 layer-2 stats, phase 2 applies BN and
# writes the output.  Statistics live in VMEM scratch across grid steps.
# ---------------------------------------------------------------------------
def _mlp_grid_kernel(x_ref, w_ref, vec_ref, o_ref, stat1_ref, stat2_ref,
                     *, n, tile_n, inp_p, hid_p, out_p):
    phase = pl.program_id(0)
    t = pl.program_id(1)

    w1 = w_ref[0:inp_p, 0:hid_p]
    wdt = w1.dtype
    inv_n = 1.0 / n

    # Rows of this tile that are real (the final tile may be zero-padded).
    row = lax.broadcasted_iota(jnp.int32, (tile_n, 1), 0) + t * tile_n
    valid = (row < n).astype(jnp.float32)

    # h1 is needed in every phase (recompute instead of spilling N x hid_p).
    h1 = jnp.dot(x_ref[...], w1, preferred_element_type=jnp.float32)

    def bn_relu_from(stat_ref, g, beta, h):
        mean = stat_ref[0:1, :] * inv_n
        var = jnp.maximum(stat_ref[1:2, :] * inv_n - mean * mean, 0.0)
        scale = g * lax.rsqrt(var + BN_EPS)
        shift = beta - mean * scale
        return jnp.maximum(h * scale + shift, 0.0)

    @pl.when((phase == 0) & (t == 0))
    def _():
        stat1_ref[...] = jnp.zeros_like(stat1_ref)

    @pl.when(phase == 0)
    def _():
        # zero-padded x rows give exactly-zero h1 rows (no bias) -> no mask.
        stat1_ref[0:1, :] += jnp.sum(h1, axis=0, keepdims=True)
        stat1_ref[1:2, :] += jnp.sum(h1 * h1, axis=0, keepdims=True)

    @pl.when((phase == 1) & (t == 0))
    def _():
        stat2_ref[...] = jnp.zeros_like(stat2_ref)

    @pl.when(phase == 1)
    def _():
        a1 = bn_relu_from(stat1_ref, vec_ref[0:1, 0:hid_p],
                          vec_ref[1:2, 0:hid_p], h1)
        a1 = a1 * valid            # mask pad rows so they don't pollute stats
        h2 = jnp.dot(a1.astype(wdt), w_ref[inp_p:inp_p + hid_p, 0:hid_p],
                     preferred_element_type=jnp.float32)
        stat2_ref[0:1, :] += jnp.sum(h2, axis=0, keepdims=True)
        stat2_ref[1:2, :] += jnp.sum(h2 * h2, axis=0, keepdims=True)

    @pl.when(phase == 2)
    def _():
        a1 = bn_relu_from(stat1_ref, vec_ref[0:1, 0:hid_p],
                          vec_ref[1:2, 0:hid_p], h1)
        h2 = jnp.dot(a1.astype(wdt), w_ref[inp_p:inp_p + hid_p, 0:hid_p],
                     preferred_element_type=jnp.float32)
        a2 = bn_relu_from(stat2_ref, vec_ref[2:3, 0:hid_p],
                          vec_ref[3:4, 0:hid_p], h2)
        o_ref[...] = (jnp.dot(a2.astype(wdt),
                              w_ref[inp_p + hid_p:inp_p + 2 * hid_p, 0:out_p],
                              preferred_element_type=jnp.float32)
                      + vec_ref[4:5, 0:out_p]).astype(o_ref.dtype)


# ---------------------------------------------------------------------------
# Forward wrapper.
# ---------------------------------------------------------------------------
def gru_hidden_state_forward(x, prepared, *, tile_n=1024, force_grid=False):
    """x: (N, inp_dim).  prepared: output of prepare_params (call it once)."""
    inp_dim, hid, out_dim, inp_p, hid_p, out_p, wp = prepared["dims"]
    n = x.shape[0]
    assert x.shape[1] == inp_dim
    cdt = prepared["compute_dtype"]
    wslab, vecslab = prepared["wslab"], prepared["vecslab"]

    x = x.astype(cdt)
    if inp_dim != inp_p:                     # only when inp_dim % 8 != 0
        x = jnp.pad(x, ((0, 0), (0, inp_p - inp_dim)))

    vmem_limit = _vmem_limit_bytes()
    itemsize = jnp.dtype(cdt).itemsize
    per_row = itemsize * (inp_p + hid_p) + 4 * (3 * hid_p + out_p)
    weight_bytes = wslab.size * itemsize + vecslab.size * 4
    use_grid = force_grid or (n * per_row + weight_bytes > vmem_limit // 2)

    if not use_grid:
        kern = functools.partial(_mlp_small_kernel,
                                 inp_p=inp_p, hid_p=hid_p, out_p=out_p)
        vmem = pl.BlockSpec(memory_space=pltpu.MemorySpace.VMEM)
        out_padded = pl.pallas_call(
            kern,
            out_shape=jax.ShapeDtypeStruct((n, out_p), jnp.float32),
            in_specs=[vmem, vmem, vmem],
            out_specs=vmem,
            compiler_params=pltpu.CompilerParams(vmem_limit_bytes=vmem_limit),
        )(x, wslab, vecslab)
        return out_padded[:, :out_dim]

    # Gridded (large-N) path.
    tile_n = _round_up(min(tile_n, max(n, SUBLANE)), SUBLANE)
    n_tiles = -(-n // tile_n)
    n_pad = n_tiles * tile_n
    if n_pad != n:
        x = jnp.pad(x, ((0, n_pad - n), (0, 0)))

    kern = functools.partial(_mlp_grid_kernel, n=n, tile_n=tile_n,
                             inp_p=inp_p, hid_p=hid_p, out_p=out_p)
    grid_spec = pltpu.PrefetchScalarGridSpec(
        num_scalar_prefetch=0,
        grid=(3, n_tiles),
        in_specs=[
            pl.BlockSpec((tile_n, inp_p), lambda p, t: (t, 0)),
            pl.BlockSpec(wslab.shape, lambda p, t: (0, 0)),
            pl.BlockSpec(vecslab.shape, lambda p, t: (0, 0)),
        ],
        out_specs=pl.BlockSpec((tile_n, out_p), lambda p, t: (t, 0)),
        scratch_shapes=[pltpu.VMEM((2, hid_p), jnp.float32),
                        pltpu.VMEM((2, hid_p), jnp.float32)],
    )
    out_padded = pl.pallas_call(
        kern,
        out_shape=jax.ShapeDtypeStruct((n_pad, out_p), jnp.float32),
        grid_spec=grid_spec,
        compiler_params=pltpu.CompilerParams(
            dimension_semantics=("arbitrary", "arbitrary"),
            vmem_limit_bytes=vmem_limit),
    )(x, wslab, vecslab)
    return out_padded[:n, :out_dim]


# ---------------------------------------------------------------------------
# Init + pure-JAX reference (full PyTorch math incl. b1/b2, two-pass var).
# ---------------------------------------------------------------------------
def init_params(key, inp_dim, hidden_dim, out_dim):
    ks = jax.random.split(key, 6)

    def linear(kw, kb, fan_in, fan_out):
        bound = 1.0 / jnp.sqrt(fan_in)
        w = jax.random.uniform(kw, (fan_out, fan_in), jnp.float32, -bound, bound)
        b = jax.random.uniform(kb, (fan_out,), jnp.float32, -bound, bound)
        return w, b

    w1, b1 = linear(ks[0], ks[1], inp_dim, hidden_dim)
    w2, b2 = linear(ks[2], ks[3], hidden_dim, hidden_dim)
    w3, b3 = linear(ks[4], ks[5], hidden_dim, out_dim)
    return {
        "w1": w1, "b1": b1,
        "g1": jnp.ones((hidden_dim,), jnp.float32),
        "beta1": jnp.zeros((hidden_dim,), jnp.float32),
        "w2": w2, "b2": b2,
        "g2": jnp.ones((hidden_dim,), jnp.float32),
        "beta2": jnp.zeros((hidden_dim,), jnp.float32),
        "w3": w3, "b3": b3,
    }


def reference_forward(x, p):
    def bn_relu(h, g, beta):
        mean = jnp.mean(h, axis=0, keepdims=True)
        var = jnp.mean((h - mean) ** 2, axis=0, keepdims=True)
        return jnp.maximum((h - mean) / jnp.sqrt(var + BN_EPS) * g + beta, 0.0)

    h = bn_relu(x @ p["w1"].T + p["b1"], p["g1"], p["beta1"])
    h = bn_relu(h @ p["w2"].T + p["b2"], p["g2"], p["beta2"])
    return h @ p["w3"].T + p["b3"]


if __name__ == "__main__":
    key = jax.random.PRNGKey(0)
    k_x, k_p, k_big = jax.random.split(key, 3)

    batch, inp_dim, hidden_dim, out_dim = 8, 16, 32, 8
    x = jax.random.normal(k_x, (batch, inp_dim), jnp.float32)
    params = init_params(k_p, inp_dim, hidden_dim, out_dim)

    prepared = prepare_params(params)          # one-time prep (hoisted)

    # 1) small-N whole-batch-resident path
    out = jax.block_until_ready(gru_hidden_state_forward(x, prepared))
    ref = reference_forward(x, params)
    assert out.shape == (batch, out_dim)
    assert jnp.allclose(out, ref, atol=1e-4, rtol=1e-4), "small-path mismatch"

    # 2) gridded large-N path (non-multiple batch exercises pad-row masking)
    n_big = 2000
    x_big = jax.random.normal(k_big, (n_big, inp_dim), jnp.float32)
    out_big = jax.block_until_ready(
        gru_hidden_state_forward(x_big, prepared, tile_n=512, force_grid=True))
    ref_big = reference_forward(x_big, params)
    assert out_big.shape == (n_big, out_dim)
    assert jnp.allclose(out_big, ref_big, atol=2e-3, rtol=2e-3), "grid-path mismatch"

    # 3) optional bf16 MXU-dot path (stats / accumulation stay f32)
    prepared_bf16 = prepare_params(params, compute_dtype=jnp.bfloat16)
    out_bf16 = jax.block_until_ready(gru_hidden_state_forward(x, prepared_bf16))
    assert jnp.allclose(out_bf16, ref, atol=1e-1, rtol=1e-1), "bf16-path mismatch"

    print("KERNEL_OK")
</pallas_src>

<mosaic_0001>
module attributes {stable_mosaic.version = 11 : i64} {
  func.func @_mlp_small_kernel(%arg0: memref<8x16xf32, #tpu.memory_space<vmem>>, %arg1: memref<272x128xf32, #tpu.memory_space<vmem>>, %arg2: memref<8x128xf32, #tpu.memory_space<vmem>>, %arg3: memref<8x128xf32, #tpu.memory_space<vmem>>) attributes {dimension_semantics = [], scalar_prefetch = 0 : i64, scratch_operands = 0 : i64, tpu.core_type = #tpu.core_type<tc>} {
    %c0 = arith.constant 0 : index
    %c0_0 = arith.constant 0 : index
    %0 = vector.load %arg1[%c0, %c0_0] : memref<272x128xf32, #tpu.memory_space<vmem>>, vector<16x128xf32>
    %c16 = arith.constant 16 : index
    %c0_1 = arith.constant 0 : index
    %1 = vector.load %arg1[%c16, %c0_1] : memref<272x128xf32, #tpu.memory_space<vmem>>, vector<128x128xf32>
    %c144 = arith.constant 144 : index
    %c0_2 = arith.constant 0 : index
    %2 = vector.load %arg1[%c144, %c0_2] : memref<272x128xf32, #tpu.memory_space<vmem>>, vector<128x128xf32>
    %c0_3 = arith.constant 0 : index
    %c0_4 = arith.constant 0 : index
    %3 = vector.load %arg0[%c0_3, %c0_4] : memref<8x16xf32, #tpu.memory_space<vmem>>, vector<8x16xf32>
    %cst = arith.constant dense<0.000000e+00> : vector<8x128xf32>
    %4 = tpu.matmul %3, %0, %cst {dimension_numbers = #tpu.dot_dimension_numbers<[1], [0], [0], [1], [0, 0, 1, 1], [], []>} : vector<8x16xf32>, vector<16x128xf32>, vector<8x128xf32> -> vector<8x128xf32>
    %c0_5 = arith.constant 0 : index
    %c0_6 = arith.constant 0 : index
    %5 = vector.load %arg2[%c0_5, %c0_6] : memref<8x128xf32, #tpu.memory_space<vmem>>, vector<1x128xf32>
    %c1 = arith.constant 1 : index
    %c0_7 = arith.constant 0 : index
    %6 = vector.load %arg2[%c1, %c0_7] : memref<8x128xf32, #tpu.memory_space<vmem>>, vector<1x128xf32>
    %cst_8 = arith.constant dense<0.000000e+00> : vector<128xf32>
    %7 = vector.multi_reduction <add>, %4, %cst_8 [0] : vector<8x128xf32> to vector<128xf32>
    %8 = vector.shape_cast %7 : vector<128xf32> to vector<1x128xf32>
    %cst_9 = arith.constant 8.000000e+00 : f32
    %9 = vector.broadcast %cst_9 : f32 to vector<1x128xf32>
    %10 = arith.divf %8, %9 : vector<1x128xf32>
    %11 = arith.mulf %4, %4 : vector<8x128xf32>
    %cst_10 = arith.constant dense<0.000000e+00> : vector<128xf32>
    %12 = vector.multi_reduction <add>, %11, %cst_10 [0] : vector<8x128xf32> to vector<128xf32>
    %13 = vector.shape_cast %12 : vector<128xf32> to vector<1x128xf32>
    %cst_11 = arith.constant 8.000000e+00 : f32
    %14 = vector.broadcast %cst_11 : f32 to vector<1x128xf32>
    %15 = arith.divf %13, %14 : vector<1x128xf32>
    %16 = arith.mulf %10, %10 : vector<1x128xf32>
    %17 = arith.subf %15, %16 : vector<1x128xf32>
    %cst_12 = arith.constant 0.000000e+00 : f32
    %18 = vector.broadcast %cst_12 : f32 to vector<1x128xf32>
    %19 = arith.maximumf %17, %18 : vector<1x128xf32>
    %cst_13 = arith.constant 9.99999974E-6 : f32
    %20 = vector.broadcast %cst_13 : f32 to vector<1x128xf32>
    %21 = arith.addf %19, %20 : vector<1x128xf32>
    %22 = math.rsqrt %21 : vector<1x128xf32>
    %23 = arith.mulf %5, %22 : vector<1x128xf32>
    %24 = arith.mulf %10, %23 : vector<1x128xf32>
    %25 = arith.subf %6, %24 : vector<1x128xf32>
    %26 = vector.broadcast %23 : vector<1x128xf32> to vector<8x128xf32>
    %27 = arith.mulf %4, %26 : vector<8x128xf32>
    %28 = vector.broadcast %25 : vector<1x128xf32> to vector<8x128xf32>
    %29 = arith.addf %27, %28 : vector<8x128xf32>
    %cst_14 = arith.constant 0.000000e+00 : f32
    %30 = vector.broadcast %cst_14 : f32 to vector<8x128xf32>
    %31 = arith.maximumf %29, %30 : vector<8x128xf32>
    %cst_15 = arith.constant dense<0.000000e+00> : vector<8x128xf32>
    %32 = tpu.matmul %31, %1, %cst_15 {dimension_numbers = #tpu.dot_dimension_numbers<[1], [0], [0], [1], [0, 0, 1, 1], [], []>} : vector<8x128xf32>, vector<128x128xf32>, vector<8x128xf32> -> vector<8x128xf32>
    %c2 = arith.constant 2 : index
    %c0_16 = arith.constant 0 : index
    %33 = vector.load %arg2[%c2, %c0_16] : memref<8x128xf32, #tpu.memory_space<vmem>>, vector<1x128xf32>
    %c3 = arith.constant 3 : index
    %c0_17 = arith.constant 0 : index
    %34 = vector.load %arg2[%c3, %c0_17] : memref<8x128xf32, #tpu.memory_space<vmem>>, vector<1x128xf32>
    %cst_18 = arith.constant dense<0.000000e+00> : vector<128xf32>
    %35 = vector.multi_reduction <add>, %32, %cst_18 [0] : vector<8x128xf32> to vector<128xf32>
    %36 = vector.shape_cast %35 : vector<128xf32> to vector<1x128xf32>
    %cst_19 = arith.constant 8.000000e+00 : f32
    %37 = vector.broadcast %cst_19 : f32 to vector<1x128xf32>
    %38 = arith.divf %36, %37 : vector<1x128xf32>
    %39 = arith.mulf %32, %32 : vector<8x128xf32>
    %cst_20 = arith.constant dense<0.000000e+00> : vector<128xf32>
    %40 = vector.multi_reduction <add>, %39, %cst_20 [0] : vector<8x128xf32> to vector<128xf32>
    %41 = vector.shape_cast %40 : vector<128xf32> to vector<1x128xf32>
    %cst_21 = arith.constant 8.000000e+00 : f32
    %42 = vector.broadcast %cst_21 : f32 to vector<1x128xf32>
    %43 = arith.divf %41, %42 : vector<1x128xf32>
    %44 = arith.mulf %38, %38 : vector<1x128xf32>
    %45 = arith.subf %43, %44 : vector<1x128xf32>
    %cst_22 = arith.constant 0.000000e+00 : f32
    %46 = vector.broadcast %cst_22 : f32 to vector<1x128xf32>
    %47 = arith.maximumf %45, %46 : vector<1x128xf32>
    %cst_23 = arith.constant 9.99999974E-6 : f32
    %48 = vector.broadcast %cst_23 : f32 to vector<1x128xf32>
    %49 = arith.addf %47, %48 : vector<1x128xf32>
    %50 = math.rsqrt %49 : vector<1x128xf32>
    %51 = arith.mulf %33, %50 : vector<1x128xf32>
    %52 = arith.mulf %38, %51 : vector<1x128xf32>
    %53 = arith.subf %34, %52 : vector<1x128xf32>
    %54 = vector.broadcast %51 : vector<1x128xf32> to vector<8x128xf32>
    %55 = arith.mulf %32, %54 : vector<8x128xf32>
    %56 = vector.broadcast %53 : vector<1x128xf32> to vector<8x128xf32>
    %57 = arith.addf %55, %56 : vector<8x128xf32>
    %cst_24 = arith.constant 0.000000e+00 : f32
    %58 = vector.broadcast %cst_24 : f32 to vector<8x128xf32>
    %59 = arith.maximumf %57, %58 : vector<8x128xf32>
    %cst_25 = arith.constant dense<0.000000e+00> : vector<8x128xf32>
    %60 = tpu.matmul %59, %2, %cst_25 {dimension_numbers = #tpu.dot_dimension_numbers<[1], [0], [0], [1], [0, 0, 1, 1], [], []>} : vector<8x128xf32>, vector<128x128xf32>, vector<8x128xf32> -> vector<8x128xf32>
    %c4 = arith.constant 4 : index
    %c0_26 = arith.constant 0 : index
    %61 = vector.load %arg2[%c4, %c0_26] : memref<8x128xf32, #tpu.memory_space<vmem>>, vector<1x128xf32>
    %62 = vector.broadcast %61 : vector<1x128xf32> to vector<8x128xf32>
    %63 = arith.addf %60, %62 : vector<8x128xf32>
    %c0_27 = arith.constant 0 : index
    %c0_28 = arith.constant 0 : index
    %64 = vector.load %arg3[%c0_27, %c0_28] : memref<8x128xf32, #tpu.memory_space<vmem>>, vector<8x128xf32>
    tpu.vector_store %arg3[%c0_27, %c0_28], %63 {strides = array<i32>} : memref<8x128xf32, #tpu.memory_space<vmem>>, vector<8x128xf32>,
    return
  }
}

</mosaic_0001>

<bundles_post_ra>
// kernel: tpu_custom_call.1
= control target key start
LH: loop header
LB: loop body
LE: loop exit
PB: predicated region body
PF: predicated region fallthrough
CT: control target
= control target key end

     0   :  { %8 = vsyncpa [#allocation3], 0  ;;  %s425_s0 = inlined_call_operand.hbm [shape: f32[8,16], index: 0, kind: input, shape index: {}]   ;;  %s426_s1 = inlined_call_operand.hbm [shape: f32[272,128], index: 1, kind: input, shape index: {}]   ;;  %s427_s2 = inlined_call_operand.hbm [shape: f32[8,128], index: 2, kind: input, shape index: {}]   ;;  %s428_s3 = inlined_call_operand.hbm [shape: f32[8,128], index: 3, kind: output, shape index: {}]  }
   0x1   :  { %9 = vsyncpa [#allocation6], 0  ;;  %s26_s14 = sshll.u32 %s426_s1, 4  ;;  %s27_s14 = int_to_ptr.hbm [resolvable:$true] %s26_s14 }
   0x2   :  { %10 = vsyncpa [#allocation4], 0  ;;  %s380_s15 = smov [#allocation5]   ;;  %s16_s19 = sshll.u32 %s425_s0, 4  ;;  %s17_s19 = int_to_ptr.hbm [resolvable:$true] %s16_s19 }
   0x3   :  { %s28_s16 = sshll.u32 %s380_s15, 4  ;;  %s381_s20 = smov 128   ;;  %s29_s16 = int_to_ptr.vmem [resolvable:$true] %s28_s16 }
   0x4   :  { %s382_s21 = smov 8   ;;  %s383_s22 = smov [#allocation2]  }
   0x5   :  { %34 = dma.hbm_to_vmem [thread:$0]  %s27_s14, 4352, %s29_s16, [#allocation6], %s381_s20, %s381_s20, %s382_s21  }
   0x6   :  { %s18_s23 = sshll.u32 %s383_s22, 4  ;;  %s40_s26 = sshll.u32 %s427_s2, 4  ;;  %s19_s23 = int_to_ptr.vmem [resolvable:$true] %s18_s23  ;;  %s41_s26 = int_to_ptr.hbm [resolvable:$true] %s40_s26 }
   0x7   :  { %21 = dma.hbm_to_vmem [thread:$0]  %s17_s19, 128, %s19_s23, [#allocation3]  }
   0x8   :  { %s384_s1 = smov [#allocation7]  }
   0x9   :  { %s42_s27 = sshll.u32 %s384_s1, 4  ;;  %s43_s27 = int_to_ptr.vmem [resolvable:$true] %s42_s27 }
   0xa   :  { %45 = dma.hbm_to_vmem [thread:$0]  %s41_s26, 128, %s43_s27, [#allocation6]  }
   0xb   :  { %374 = dma.done.wait [#allocation3], 128  }
   0xc   :  { %375 = vsyncadd [#allocation3], 4294967168 }
   0xd   :  { %376 = dma.done.wait [#allocation6], 4480  }
   0xe   :  { %377 = vsyncadd [#allocation6], 4294962816  ;;  %v59_v0 = vld [vmem:[#allocation5 + $0x8] sm:$0xff]  ;;  %v58_v1 = vld [vmem:[#allocation5] sm:$0xff]  ;;  %vm93_vm0 = vcmask 130048   ;;  %v385_v3 = vmov 8.0  }
   0xf   :  { %111 = vmatpush.msra.mxu0 %v59_v0  ;;  %v92_v2 = vld [vmem:[#allocation2] sm:$0xff]  ;;  %272 = vrcp.f32 %v385_v3  ;;  %v75_v4 = vld [vmem:[#allocation5 + $0x88] sm:$0xff]  ;;  %v74_v6 = vld [vmem:[#allocation5 + $0x80] sm:$0xff]  ;;  %s386_s0 = smov [#allocation8]   ;;  %s252_s30 = sshll.u32 %s428_s3, 4  ;;  %s253_s30 = int_to_ptr.hbm [resolvable:$true] %s252_s30 }
  0x10   :  { %163 = vmatpush.msra.mxu1 %v75_v4  ;;  %v73_v7 = vld [vmem:[#allocation5 + $0x78] sm:$0xff]  ;;  %v72_v9 = vld [vmem:[#allocation5 + $0x70] sm:$0xff]  ;;  %v71_v10 = vld [vmem:[#allocation5 + $0x68] sm:$0xff]  ;;  %s250_s2 = sshll.u32 %s386_s0, 4  ;;  %s251_s2 = int_to_ptr.vmem [resolvable:$true] %s250_s2 }
  0x11   :  { %112 = vmatpush.msra.mxu0 %v58_v1  ;;  %v70_v12 = vld [vmem:[#allocation5 + $0x60] sm:$0xff]  ;;  %v69_v16 = vld [vmem:[#allocation5 + $0x58] sm:$0xff]  ;;  %v68_v20 = vld [vmem:[#allocation5 + $0x50] sm:$0xff] }
  0x12   :  { %263 = vmatmul.msk.f32.vlgmr.msra.gmra.mxu0 %vm93_vm0, %v92_v2  ;;  %164 = vmatpush.msra.mxu1 %v74_v6  ;;  %v67_v23 = vld [vmem:[#allocation5 + $0x48] sm:$0xff]  ;;  %v66_v27 = vld [vmem:[#allocation5 + $0x40] sm:$0xff]  ;;  %v65_v30 = vld [vmem:[#allocation5 + $0x38] sm:$0xff] }
  0x13   :  { %v64_v34 = vld [vmem:[#allocation5 + $0x30] sm:$0xff]  ;;  %v63_v37 = vld [vmem:[#allocation5 + $0x28] sm:$0xff]  ;;  %v62_v38 = vld [vmem:[#allocation5 + $0x20] sm:$0xff] }
  0x14   :  { %165 = vmatpush.msra.mxu1 %v73_v7  ;;  %v61_v41 = vld [vmem:[#allocation5 + $0x18] sm:$0xff]  ;;  %v60_v43 = vld [vmem:[#allocation5 + $0x10] sm:$0xff]  ;;  %v91_v63 = vld [vmem:[#allocation5 + $0x108] sm:$0xff] }
  0x15   :  { %v273_v5 = vpop.eup %272  ;;  %v117_v51 = vld [vmem:[#allocation7] sm:$0x1]  ;;  %v118_v55 = vld [vmem:[#allocation7 + $0x1] sm:$0x1]  ;;  %224 = vmatpush.msra.mxu2 %v91_v63  ;;  %v90_v0 = vld [vmem:[#allocation5 + $0x100] sm:$0xff] }
  0x16   :  { %v126_v8 = vmul.f32 8.0, %v273_v5  ;;  %166 = vmatpush.msra.mxu1 %v72_v9  ;;  %vm130_vm1 = vweird.f32 %v273_v5  ;;  %v89_v1 = vld [vmem:[#allocation5 + $0xf8] sm:$0xff]  ;;  %v88_v2 = vld [vmem:[#allocation5 + $0xf0] sm:$0xff]  ;;  %v87_v3 = vld [vmem:[#allocation5 + $0xe8] sm:$0xff] }
  0x17   :  { %225 = vmatpush.msra.mxu2 %v90_v0  ;;  %v86_v4 = vld [vmem:[#allocation5 + $0xe0] sm:$0xff] }
  0x18   :  { %v127_v11 = vsub.f32 1.0, %v126_v8  ;;  %167 = vmatpush.msra.mxu1 %v71_v10  ;;  %v85_v8 = vld [vmem:[#allocation5 + $0xd8] sm:$0xff] }
  0x19   :  { %226 = vmatpush.msra.mxu2 %v89_v1 }
  0x1a   :  { %168 = vmatpush.msra.mxu1 %v70_v12  ;;  %v128_v17 = vmul.f32 %v273_v5, %v127_v11  ;;  %v84_v11 = vld [vmem:[#allocation5 + $0xd0] sm:$0xff] }
  0x1b   :  { %227 = vmatpush.msra.mxu2 %v88_v2 }
  0x1c   :  { %169 = vmatpush.msra.mxu1 %v69_v16  ;;  %v129_v24 = vadd.f32 %v273_v5, %v128_v17  ;;  %v82_v17 = vld [vmem:[#allocation5 + $0xc0] sm:$0xff] }
  0x1d   :  { %228 = vmatpush.msra.mxu2 %v87_v3 }
  0x1e   :  { %170 = vmatpush.msra.mxu1 %v68_v20  ;;  %v416_v31 = vsel %vm130_vm1, %v273_v5, %v129_v24  ;;  %v81_v20 = vld [vmem:[#allocation5 + $0xb8] sm:$0xff] }
  0x1f   :  { %229 = vmatpush.msra.mxu2 %v86_v4 }
  0x20   :  { %171 = vmatpush.msra.mxu1 %v67_v23  ;;  %v80_v23 = vld [vmem:[#allocation5 + $0xb0] sm:$0xff] }
  0x21   :  { %230 = vmatpush.msra.mxu2 %v85_v8 }
  0x22   :  { %172 = vmatpush.msra.mxu1 %v66_v27  ;;  %v78_v27 = vld [vmem:[#allocation5 + $0xa0] sm:$0xff] }
  0x23   :  { %231 = vmatpush.msra.mxu2 %v84_v11 }
  0x24   :  { %173 = vmatpush.msra.mxu1 %v65_v30  ;;  %v77_v30 = vld [vmem:[#allocation5 + $0x98] sm:$0xff] }
  0x26   :  { %174 = vmatpush.msra.mxu1 %v64_v34 }
  0x28   :  { %175 = vmatpush.msra.mxu1 %v63_v37 }
  0x2a   :  { %176 = vmatpush.msra.mxu1 %v62_v38 }
  0x2c   :  { %177 = vmatpush.msra.mxu1 %v61_v41  ;;  %v183_v41 = vld [vmem:[#allocation7 + $0x2] sm:$0x1] }
  0x2e   :  { %178 = vmatpush.msra.mxu1 %v60_v43 }
  0x8f   :  { %v114_v13 = vpop.f32.mrf.mxu0 }
  0x90   :  { %v119_v14 = vrot.slane %v114_v13, 4  ;;  %v133_v15 = vmul.f32 %v114_v13, %v114_v13 }
  0x92   :  { %v120_v18 = vadd.f32 %v119_v14, %v114_v13  ;;  %v134_v19 = vrot.slane %v133_v15, 4  ;;  %v83_v14 = vld [vmem:[#allocation5 + $0xc8] sm:$0xff] }
  0x93   :  { %232 = vmatpush.msra.mxu2 %v83_v14 }
  0x94   :  { %v121_v21 = vrot.slane %v120_v18, 2  ;;  %v135_v22 = vadd.f32 %v134_v19, %v133_v15 }
  0x95   :  { %233 = vmatpush.msra.mxu2 %v82_v17 }
  0x96   :  { %v122_v25 = vadd.f32 %v121_v21, %v120_v18  ;;  %v136_v26 = vrot.slane %v135_v22, 2 }
  0x97   :  { %234 = vmatpush.msra.mxu2 %v81_v20 }
  0x98   :  { %v123_v28 = vrot.slane %v122_v25, 1  ;;  %v137_v29 = vadd.f32 %v136_v26, %v135_v22  ;;  %v79_v26 = vld [vmem:[#allocation5 + $0xa8] sm:$0xff] }
  0x99   :  { %235 = vmatpush.msra.mxu2 %v80_v23 }
  0x9a   :  { %v124_v32 = vadd.f32 %v123_v28, %v122_v25  ;;  %v138_v33 = vrot.slane %v137_v29, 1 }
  0x9b   :  { %236 = vmatpush.msra.mxu2 %v79_v26 }
  0x9c   :  { %v132_v35 = vmul.f32 %v416_v31, %v124_v32  ;;  %v139_v36 = vadd.f32 %v138_v33, %v137_v29  ;;  %v76_v33 = vld [vmem:[#allocation5 + $0x90] sm:$0xff] }
  0x9d   :  { %237 = vmatpush.msra.mxu2 %v78_v27 }
  0x9e   :  { %v140_v39 = vmul.f32 %v139_v36, %v416_v31  ;;  %v141_v40 = vmul.f32 %v132_v35, %v132_v35 }
  0x9f   :  { %238 = vmatpush.msra.mxu2 %v77_v30 }
  0xa0   :  { %v142_v42 = vsub.f32 %v140_v39, %v141_v40 }
  0xa1   :  { %239 = vmatpush.msra.mxu2 %v76_v33 }
  0xa2   :  { %v143_v44 = vmax.f32 %v142_v42, 0.0 }
  0xa4   :  { %v144_v45 = vadd.f32 1e-05, %v143_v44  ;;  %v184_v44 = vld [vmem:[#allocation7 + $0x3] sm:$0x1] }
  0xa6   :  { %274 = vrsqrt.f32 %v144_v45  ;;  %vm151_vm3 = vweird.f32 %v144_v45 }
  0xac   :  { %v275_v46 = vpop.eup %274 }
  0xad   :  { %v146_v47 = vmul.f32 %v275_v46, %v144_v45  ;;  %vm152_vm2 = vweird.f32 %v275_v46 }
  0xae   :  { %vm153_vm4 = vmor %vm151_vm3, %vm152_vm2 }
  0xaf   :  { %v147_v48 = vmul.f32 %v275_v46, %v146_v47 }
  0xb1   :  { %v148_v49 = vmul.f32 0.5, %v147_v48 }
  0xb3   :  { %v149_v50 = vsub.f32 1.5, %v148_v49 }
  0xb5   :  { %v150_v52 = vmul.f32 %v275_v46, %v149_v50 }
  0xb7   :  { %v154_v53 = vsel %vm153_vm4, %v275_v46, %v150_v52  ;;  %v271_v52 = vld [vmem:[#allocation7 + $0x4] ss:$0 sm:$0xff] }
  0xb8   :  { %v155_v54 = vmul.f32 %v154_v53, %v117_v51 }
  0xba   :  { %v158_v56 = vperm.slane %v155_v54, 0  ;;  %v156_v57 = vmul.f32 %v155_v54, %v132_v35 }
  0xbc   :  { %v157_v58 = vsub.f32 %v118_v55, %v156_v57  ;;  %v159_v59 = vmul.f32 %v158_v56, %v114_v13 }
  0xbe   :  { %v160_v60 = vperm.slane %v157_v58, 0 }
  0xc0   :  { %v161_v61 = vadd.f32 %v160_v60, %v159_v59 }
  0xc2   :  { %v162_v62 = vmax.f32 %v161_v61, 0.0 }
  0xc4   :  { %179 = vmatmul.f32.vlgmr.msra.gmra.mxu1 %v162_v62 }
 0x141   :  { %v180_v5 = vpop.f32.mrf.mxu1 }
 0x142   :  { %v185_v6 = vrot.slane %v180_v5, 4  ;;  %v192_v7 = vmul.f32 %v180_v5, %v180_v5 }
 0x144   :  { %v186_v9 = vadd.f32 %v185_v6, %v180_v5  ;;  %v193_v10 = vrot.slane %v192_v7, 4 }
 0x146   :  { %v187_v12 = vrot.slane %v186_v9, 2  ;;  %v194_v13 = vadd.f32 %v193_v10, %v192_v7 }
 0x148   :  { %v188_v15 = vadd.f32 %v187_v12, %v186_v9  ;;  %v195_v16 = vrot.slane %v194_v13, 2 }
 0x14a   :  { %v189_v18 = vrot.slane %v188_v15, 1  ;;  %v196_v19 = vadd.f32 %v195_v16, %v194_v13 }
 0x14c   :  { %v190_v21 = vadd.f32 %v189_v18, %v188_v15  ;;  %v197_v22 = vrot.slane %v196_v19, 1 }
 0x14e   :  { %v191_v24 = vmul.f32 %v190_v21, %v416_v31  ;;  %v198_v25 = vadd.f32 %v197_v22, %v196_v19 }
 0x150   :  { %v199_v28 = vmul.f32 %v198_v25, %v416_v31  ;;  %v200_v29 = vmul.f32 %v191_v24, %v191_v24 }
 0x152   :  { %v201_v32 = vsub.f32 %v199_v28, %v200_v29 }
 0x154   :  { %v202_v34 = vmax.f32 %v201_v32, 0.0 }
 0x156   :  { %v203_v35 = vadd.f32 1e-05, %v202_v34 }
 0x158   :  { %276 = vrsqrt.f32 %v203_v35  ;;  %vm210_vm6 = vweird.f32 %v203_v35 }
 0x15e   :  { %v277_v36 = vpop.eup %276 }
 0x15f   :  { %v205_v37 = vmul.f32 %v277_v36, %v203_v35  ;;  %vm211_vm5 = vweird.f32 %v277_v36 }
 0x160   :  { %vm212_vm7 = vmor %vm210_vm6, %vm211_vm5 }
 0x161   :  { %v206_v38 = vmul.f32 %v277_v36, %v205_v37 }
 0x163   :  { %v207_v39 = vmul.f32 0.5, %v206_v38 }
 0x165   :  { %v208_v40 = vsub.f32 1.5, %v207_v39 }
 0x167   :  { %v209_v42 = vmul.f32 %v277_v36, %v208_v40 }
 0x169   :  { %v213_v31 = vsel %vm212_vm7, %v277_v36, %v209_v42 }
 0x16a   :  { %v214_v43 = vmul.f32 %v213_v31, %v183_v41 }
 0x16c   :  { %v217_v45 = vperm.slane %v214_v43, 0  ;;  %v215_v46 = vmul.f32 %v214_v43, %v191_v24 }
 0x16e   :  { %v216_v47 = vsub.f32 %v184_v44, %v215_v46  ;;  %v218_v48 = vmul.f32 %v217_v45, %v180_v5 }
 0x170   :  { %v219_v49 = vperm.slane %v216_v47, 0 }
 0x172   :  { %v220_v50 = vadd.f32 %v219_v49, %v218_v48 }
 0x174   :  { %v221_v51 = vmax.f32 %v220_v50, 0.0 }
 0x176   :  { %240 = vmatmul.f32.vlgmr.msra.gmra.mxu2 %v221_v51 }
 0x1f9   :  { %v241_v53 = vpop.f32.mrf.mxu2 }
 0x1fa   :  { %v242_v54 = vadd.f32 %v271_v52, %v241_v53 }
 0x1fc   :  { %244 = vst [vmem:[#allocation8] sm:$0xff] %v242_v54 }
 0x1fd   :  { %255 = dma.vmem_to_hbm [thread:$0]  %s251_s2, 128, %s253_s30, [#allocation4]  }
 0x1fe   :  { %378 = dma.done.wait [#allocation4], 128  }
 0x1ff   :  { %379 = vsyncadd [#allocation4], 4294967168 }
 0x200   :  { %260 = vsyncpa [#allocation3], 1 }
 0x201   :  { %261 = vsyncpa [#allocation6], 1 }
 0x202   :  { %262 = vsyncpa [#allocation4], 1 }

</bundles_post_ra>
